<compile_context>
chip_gen: v7x
topology: tpu7x:2x2x1
jax: 0.10.0
libtpu: 0.0.40
codegen_flags: <defaults>
</compile_context>

<pallas_src>
import jax
import jax.numpy as jnp
from jax.experimental import pallas as pl
from jax.experimental.pallas import tpu as pltpu

IN_FEATURES = 512
NUM_CLASSES = 2

# 2048 rows x 512 feats x 4 B = 4 MiB per x buffer; double-buffered = 8 MiB,
# safe on v5e's 16 MiB scoped-VMEM default and big enough to amortize the
# ~0.35 us per-grid-step overhead on all generations.
DEFAULT_TILE_B = 2048


def _face_attr_decoder_kernel(x_ref, w_ref, b_ref, o_ref):
    # Linear: logits = x @ W + b (W pre-transposed to [512, 2]); MXU accumulates in
    # f32 regardless of the activation dtype (f32 or bf16).
    logits = jnp.dot(x_ref[...], w_ref[...], preferred_element_type=jnp.float32)
    logits = logits + b_ref[...].astype(jnp.float32)  # (1, 2) broadcasts over rows

    # Numerically-stable log-softmax over dim=1 (class axis, width 2), all in f32.
    m = jnp.max(logits, axis=-1, keepdims=True)
    z = logits - m
    lse = jnp.log(jnp.sum(jnp.exp(z), axis=-1, keepdims=True))
    o_ref[...] = (z - lse).astype(o_ref.dtype)


def face_attribute_decoder(x, w, b, *, tile_b=None):
    """x: [B, 512] (f32 or bf16), w: [512, 2], b: [2] -> log-probs [B, 2] f32."""
    B = x.shape[0]
    assert x.shape[1] == IN_FEATURES and w.shape == (IN_FEATURES, NUM_CLASSES)

    if tile_b is None:
        tile_b = DEFAULT_TILE_B
    if B <= tile_b:
        # Single full-extent block along batch (any B allowed when block == full dim).
        tile_b = B
    else:
        # Sub-full batch tiles must be sublane-aligned (multiple of 8); ragged
        # remainder blocks are padded by Pallas (padded rows are discarded on store).
        tile_b = max(8, (tile_b // 8) * 8)
    grid = (pl.cdiv(B, tile_b),)

    w = w.astype(x.dtype)                                # bf16 path halves HBM traffic
    b2d = b.reshape(1, NUM_CLASSES).astype(jnp.float32)  # bias added after f32 accum

    bytes_accessed = int(
        x.size * x.dtype.itemsize
        + w.size * w.dtype.itemsize
        + b2d.size * b2d.dtype.itemsize
        + B * NUM_CLASSES * 4
    )
    cost = pl.CostEstimate(
        flops=int(2 * B * IN_FEATURES * NUM_CLASSES + 8 * B * NUM_CLASSES),
        transcendentals=int(3 * B),  # exp per logit + log per row (approx)
        bytes_accessed=bytes_accessed,
    )

    return pl.pallas_call(
        _face_attr_decoder_kernel,
        out_shape=jax.ShapeDtypeStruct((B, NUM_CLASSES), jnp.float32),
        grid=grid,
        in_specs=[
            # x: tiled over batch, pipelined (double-buffered) tile by tile.
            pl.BlockSpec((tile_b, IN_FEATURES), lambda i: (i, 0)),
            # W and b: constant index_map -> stay resident in VMEM across the grid.
            pl.BlockSpec((IN_FEATURES, NUM_CLASSES), lambda i: (0, 0)),
            pl.BlockSpec((1, NUM_CLASSES), lambda i: (0, 0)),
        ],
        out_specs=pl.BlockSpec((tile_b, NUM_CLASSES), lambda i: (i, 0)),
        compiler_params=pltpu.CompilerParams(
            dimension_semantics=("parallel",),  # megacore sharding on v7x
        ),
        cost_estimate=cost,
    )(x, w, b2d)


def init_params(key):
    """Deterministic init mirroring nn.Linear(512, 2) default (uniform +-1/sqrt(fan_in))."""
    kw, kb = jax.random.split(key)
    bound = 1.0 / (IN_FEATURES ** 0.5)
    # PyTorch weight is [2, 512]; store transposed as [512, 2] for the kernel.
    w_t = jax.random.uniform(
        kw, (IN_FEATURES, NUM_CLASSES), jnp.float32, minval=-bound, maxval=bound
    )
    b = jax.random.uniform(
        kb, (NUM_CLASSES,), jnp.float32, minval=-bound, maxval=bound
    )
    return w_t, b


def _ref_forward(x, w, b):
    logits = x.astype(jnp.float32) @ w.astype(jnp.float32) + b[None, :]
    return jax.nn.log_softmax(logits, axis=1)


if __name__ == "__main__":
    key = jax.random.PRNGKey(0)
    kx, kp = jax.random.split(key)
    w_t, b = init_params(kp)

    # 1) Small batch, single full-extent block (typical tiny-B head usage).
    B = 8
    x = jax.random.normal(kx, (B, IN_FEATURES), dtype=jnp.float32)
    out = jax.block_until_ready(face_attribute_decoder(x, w_t, b))
    assert out.shape == (B, NUM_CLASSES)
    assert jnp.allclose(out, _ref_forward(x, w_t, b), atol=1e-4, rtol=1e-4), \
        "f32 single-block mismatch vs reference"

    # 2) Batch that exercises the batch grid + ragged remainder (tile 16 -> 3 steps,
    #    last block padded). Padded rows are discarded by the masked store.
    B2 = 40
    x2 = jax.random.normal(jax.random.PRNGKey(1), (B2, IN_FEATURES), dtype=jnp.float32)
    out2 = jax.block_until_ready(face_attribute_decoder(x2, w_t, b, tile_b=16))
    assert out2.shape == (B2, NUM_CLASSES)
    assert jnp.allclose(out2, _ref_forward(x2, w_t, b), atol=1e-4, rtol=1e-4), \
        "f32 tiled/ragged mismatch vs reference"

    # 3) bf16 activation path (halved HBM traffic): bf16 x bf16 dot, f32 accumulate,
    #    f32 log-softmax. Reference uses the same bf16-rounded operands.
    x3 = x.astype(jnp.bfloat16)
    out3 = jax.block_until_ready(face_attribute_decoder(x3, w_t, b))
    ref3 = _ref_forward(
        x3.astype(jnp.float32), w_t.astype(jnp.bfloat16).astype(jnp.float32), b
    )
    assert jnp.allclose(out3, ref3, atol=2e-2, rtol=2e-2), "bf16 mismatch vs reference"

    print("KERNEL_OK")
</pallas_src>

<mosaic_0001>
module attributes {stable_mosaic.version = 11 : i64} {
  func.func @_face_attr_decoder_kernel(%arg0: i32, %arg1: memref<8x512xf32, #tpu.memory_space<vmem>>, %arg2: memref<512x2xf32, #tpu.memory_space<vmem>>, %arg3: memref<1x2xf32, #tpu.memory_space<vmem>>, %arg4: memref<8x2xf32, #tpu.memory_space<vmem>>) attributes {dimension_semantics = [#tpu.dimension_semantics<parallel>], iteration_bounds = array<i64: 1>, scalar_prefetch = 0 : i64, scratch_operands = 0 : i64, tpu.core_type = #tpu.core_type<tc>, window_params = [{transform_indices = @transform_0, window_bounds = array<i64: 8, 512>}, {pipeline_mode = #tpu.pipeline_mode<synchronous>, transform_indices = @transform_1, window_bounds = array<i64: 512, 2>}, {pipeline_mode = #tpu.pipeline_mode<synchronous>, transform_indices = @transform_2, window_bounds = array<i64: 1, 2>}, {transform_indices = @transform_3, window_bounds = array<i64: 8, 2>}]} {
    %c0 = arith.constant 0 : index
    %c0_0 = arith.constant 0 : index
    %0 = vector.load %arg1[%c0, %c0_0] : memref<8x512xf32, #tpu.memory_space<vmem>>, vector<8x512xf32>
    %c0_1 = arith.constant 0 : index
    %c0_2 = arith.constant 0 : index
    %1 = vector.load %arg2[%c0_1, %c0_2] : memref<512x2xf32, #tpu.memory_space<vmem>>, vector<512x2xf32>
    %cst = arith.constant dense<0.000000e+00> : vector<8x2xf32>
    %2 = tpu.matmul %0, %1, %cst {dimension_numbers = #tpu.dot_dimension_numbers<[1], [0], [0], [1], [0, 0, 1, 1], [], []>} : vector<8x512xf32>, vector<512x2xf32>, vector<8x2xf32> -> vector<8x2xf32>
    %c0_3 = arith.constant 0 : index
    %c0_4 = arith.constant 0 : index
    %3 = vector.load %arg3[%c0_3, %c0_4] : memref<1x2xf32, #tpu.memory_space<vmem>>, vector<1x2xf32>
    %4 = vector.broadcast %3 : vector<1x2xf32> to vector<8x2xf32>
    %5 = arith.addf %2, %4 : vector<8x2xf32>
    %cst_5 = arith.constant dense<0xFF800000> : vector<8xf32>
    %6 = vector.multi_reduction <maximumf>, %5, %cst_5 [1] : vector<8x2xf32> to vector<8xf32>
    %7 = vector.shape_cast %6 : vector<8xf32> to vector<8x1xf32>
    %8 = vector.broadcast %7 : vector<8x1xf32> to vector<8x2xf32>
    %9 = arith.subf %5, %8 : vector<8x2xf32>
    %10 = math.exp %9 : vector<8x2xf32>
    %cst_6 = arith.constant dense<0.000000e+00> : vector<8xf32>
    %11 = vector.multi_reduction <add>, %10, %cst_6 [1] : vector<8x2xf32> to vector<8xf32>
    %12 = vector.shape_cast %11 : vector<8xf32> to vector<8x1xf32>
    %13 = math.log %12 : vector<8x1xf32>
    %14 = vector.broadcast %13 : vector<8x1xf32> to vector<8x2xf32>
    %15 = arith.subf %9, %14 : vector<8x2xf32>
    %c0_7 = arith.constant 0 : index
    %c0_8 = arith.constant 0 : index
    %16 = vector.load %arg4[%c0_7, %c0_8] : memref<8x2xf32, #tpu.memory_space<vmem>>, vector<8x2xf32>
    tpu.vector_store %arg4[%c0_7, %c0_8], %15 {strides = array<i32>} : memref<8x2xf32, #tpu.memory_space<vmem>>, vector<8x2xf32>,
    return
  }
  func.func @transform_0(%arg0: i32) -> (i32, i32) {
    %c0_i32 = arith.constant 0 : i32
    %c0_i32_0 = arith.constant 0 : i32
    return %arg0, %c0_i32 : i32, i32
  }
  func.func @transform_1(%arg0: i32) -> (i32, i32) {
    %c0_i32 = arith.constant 0 : i32
    %c0_i32_0 = arith.constant 0 : i32
    %c0_i32_1 = arith.constant 0 : i32
    return %c0_i32, %c0_i32_0 : i32, i32
  }
  func.func @transform_2(%arg0: i32) -> (i32, i32) {
    %c0_i32 = arith.constant 0 : i32
    %c0_i32_0 = arith.constant 0 : i32
    %c0_i32_1 = arith.constant 0 : i32
    return %c0_i32, %c0_i32_0 : i32, i32
  }
  func.func @transform_3(%arg0: i32) -> (i32, i32) {
    %c0_i32 = arith.constant 0 : i32
    %c0_i32_0 = arith.constant 0 : i32
    return %arg0, %c0_i32 : i32, i32
  }
}

</mosaic_0001>

<bundles_post_ra>
// kernel: tpu_custom_call.1
= control target key start
LH: loop header
LB: loop body
LE: loop exit
PB: predicated region body
PF: predicated region fallthrough
CT: control target
= control target key end

     0   :  { %vm229_vm0 = vcmask 15360   ;;  %s619_s1 = inlined_call_operand.vmem [shape: f32[512,2], index: 1, kind: input, shape index: {}]   ;;  %s620_s0 = inlined_call_operand.vmem [shape: f32[8,512], index: 0, kind: input, shape index: {}]   ;;  %s621_s2 = inlined_call_operand.vmem [shape: f32[1,2], index: 2, kind: input, shape index: {}]   ;;  %s622_s3 = inlined_call_operand.vmem [shape: f32[8,2], index: 3, kind: output, shape index: {}]  }
   0x1   :  { %v34_v0 = vld [vmem:[%s619_s1 + $0x80] sm:$0xff]  ;;  %v35_v1 = vld [vmem:[%s619_s1 + $0x88] sm:$0xff]  ;;  %v36_v11 = vld [vmem:[%s619_s1 + $0x90] sm:$0xff] }
   0x2   :  { %v18_v2 = vld [vmem:[%s619_s1] sm:$0xff]  ;;  %v318_v3 = vpack.c.bf16 %v35_v1, %v34_v0  ;;  %v19_v4 = vld [vmem:[%s619_s1 + $0x8] sm:$0xff]  ;;  %v37_v13 = vld [vmem:[%s619_s1 + $0x98] sm:$0xff] }
   0x3   :  { %v66_v5 = vld [vmem:[%s619_s1 + $0x180] sm:$0xff]  ;;  %v67_v6 = vld [vmem:[%s619_s1 + $0x188] sm:$0xff]  ;;  %v320_v7 = vpack.c.bf16 %v19_v4, %v18_v2  ;;  %v20_v14 = vld [vmem:[%s619_s1 + $0x10] sm:$0xff]  ;;  %v322_v16 = vpack.c.bf16 %v37_v13, %v36_v11 }
   0x4   :  { %v350_v8 = vpack.c.bf16 %v67_v6, %v66_v5  ;;  %v50_v9 = vld [vmem:[%s619_s1 + $0x100] sm:$0xff]  ;;  %v51_v10 = vld [vmem:[%s619_s1 + $0x108] sm:$0xff]  ;;  %319 = vmatprep.subr.bf16.mxu0 %v318_v3  ;;  %v21_v15 = vld [vmem:[%s619_s1 + $0x18] sm:$0xff] }
   0x5   :  { %v352_v12 = vpack.c.bf16 %v51_v10, %v50_v9  ;;  %321 = vmatpush3.bf16.msra.mxu0 %v320_v7  ;;  %v324_v17 = vpack.c.bf16 %v21_v15, %v20_v14  ;;  %v68_v18 = vld [vmem:[%s619_s1 + $0x190] sm:$0xff]  ;;  %v69_v19 = vld [vmem:[%s619_s1 + $0x198] sm:$0xff]  ;;  %v38_v23 = vld [vmem:[%s619_s1 + $0xa0] sm:$0xff] }
   0x6   :  { %351 = vmatprep.subr.bf16.mxu1 %v350_v8  ;;  %v52_v20 = vld [vmem:[%s619_s1 + $0x110] sm:$0xff]  ;;  %v354_v21 = vpack.c.bf16 %v69_v19, %v68_v18  ;;  %v53_v22 = vld [vmem:[%s619_s1 + $0x118] sm:$0xff]  ;;  %v39_v24 = vld [vmem:[%s619_s1 + $0xa8] sm:$0xff]  ;;  %323 = vmatprep.subr.bf16.mxu0 %v322_v16 }
   0x7   :  { %353 = vmatpush3.bf16.msra.mxu1 %v352_v12  ;;  %v356_v25 = vpack.c.bf16 %v53_v22, %v52_v20  ;;  %v326_v26 = vpack.c.bf16 %v39_v24, %v38_v23  ;;  %v22_v27 = vld [vmem:[%s619_s1 + $0x20] sm:$0xff]  ;;  %v23_v28 = vld [vmem:[%s619_s1 + $0x28] sm:$0xff]  ;;  %v40_v35 = vld [vmem:[%s619_s1 + $0xb0] sm:$0xff] }
   0x8   :  { %v70_v29 = vld [vmem:[%s619_s1 + $0x1a0] sm:$0xff]  ;;  %355 = vmatprep.subr.bf16.mxu1 %v354_v21  ;;  %v71_v30 = vld [vmem:[%s619_s1 + $0x1a8] sm:$0xff]  ;;  %v328_v33 = vpack.c.bf16 %v23_v28, %v22_v27  ;;  %v41_v36 = vld [vmem:[%s619_s1 + $0xb8] sm:$0xff] }
   0x9   :  { %v54_v31 = vld [vmem:[%s619_s1 + $0x120] sm:$0xff]  ;;  %v55_v32 = vld [vmem:[%s619_s1 + $0x128] sm:$0xff]  ;;  %325 = vmatpush3.bf16.msra.mxu0 %v324_v17  ;;  %v358_v34 = vpack.c.bf16 %v71_v30, %v70_v29  ;;  %v24_v37 = vld [vmem:[%s619_s1 + $0x30] sm:$0xff]  ;;  %v330_v39 = vpack.c.bf16 %v41_v36, %v40_v35 }
   0xa   :  { %327 = vmatprep.subr.bf16.mxu0 %v326_v26  ;;  %v360_v38 = vpack.c.bf16 %v55_v32, %v54_v31  ;;  %v25_v40 = vld [vmem:[%s619_s1 + $0x38] sm:$0xff]  ;;  %v72_v41 = vld [vmem:[%s619_s1 + $0x1b0] sm:$0xff]  ;;  %v42_v46 = vld [vmem:[%s619_s1 + $0xc0] sm:$0xff] }
   0xb   :  { %357 = vmatpush3.bf16.msra.mxu1 %v356_v25  ;;  %v73_v42 = vld [vmem:[%s619_s1 + $0x1b8] sm:$0xff]  ;;  %v56_v44 = vld [vmem:[%s619_s1 + $0x130] sm:$0xff]  ;;  %v43_v47 = vld [vmem:[%s619_s1 + $0xc8] sm:$0xff]  ;;  %v332_v48 = vpack.c.bf16 %v25_v40, %v24_v37 }
   0xc   :  { %359 = vmatprep.subr.bf16.mxu1 %v358_v34  ;;  %v362_v43 = vpack.c.bf16 %v73_v42, %v72_v41  ;;  %v57_v45 = vld [vmem:[%s619_s1 + $0x138] sm:$0xff]  ;;  %v74_v49 = vld [vmem:[%s619_s1 + $0x1c0] sm:$0xff]  ;;  %v75_v50 = vld [vmem:[%s619_s1 + $0x1c8] sm:$0xff]  ;;  %v334_v52 = vpack.c.bf16 %v43_v47, %v42_v46 }
   0xd   :  { %329 = vmatpush3.bf16.msra.mxu0 %v328_v33  ;;  %v364_v51 = vpack.c.bf16 %v57_v45, %v56_v44  ;;  %v26_v53 = vld [vmem:[%s619_s1 + $0x40] sm:$0xff]  ;;  %v27_v54 = vld [vmem:[%s619_s1 + $0x48] sm:$0xff]  ;;  %v366_v56 = vpack.c.bf16 %v75_v50, %v74_v49  ;;  %v44_v58 = vld [vmem:[%s619_s1 + $0xd0] sm:$0xff] }
   0xe   :  { %331 = vmatprep.subr.bf16.mxu0 %v330_v39  ;;  %v58_v55 = vld [vmem:[%s619_s1 + $0x140] sm:$0xff]  ;;  %v59_v57 = vld [vmem:[%s619_s1 + $0x148] sm:$0xff]  ;;  %v45_v59 = vld [vmem:[%s619_s1 + $0xd8] sm:$0xff]  ;;  %v336_v62 = vpack.c.bf16 %v27_v54, %v26_v53 }
   0xf   :  { %361 = vmatpush3.bf16.msra.mxu1 %v360_v38  ;;  %v76_v60 = vld [vmem:[%s619_s1 + $0x1d0] sm:$0xff]  ;;  %v77_v61 = vld [vmem:[%s619_s1 + $0x1d8] sm:$0xff]  ;;  %v368_v63 = vpack.c.bf16 %v59_v57, %v58_v55  ;;  %v338_v0 = vpack.c.bf16 %v45_v59, %v44_v58  ;;  %v46_v6 = vld [vmem:[%s619_s1 + $0xe0] sm:$0xff] }
  0x10   :  { %363 = vmatprep.subr.bf16.mxu1 %v362_v43  ;;  %v28_v1 = vld [vmem:[%s619_s1 + $0x50] sm:$0xff]  ;;  %v29_v2 = vld [vmem:[%s619_s1 + $0x58] sm:$0xff]  ;;  %v370_v4 = vpack.c.bf16 %v77_v61, %v76_v60  ;;  %v47_v7 = vld [vmem:[%s619_s1 + $0xe8] sm:$0xff] }
  0x11   :  { %333 = vmatpush3.bf16.msra.mxu0 %v332_v48  ;;  %v60_v3 = vld [vmem:[%s619_s1 + $0x150] sm:$0xff]  ;;  %v61_v5 = vld [vmem:[%s619_s1 + $0x158] sm:$0xff]  ;;  %v78_v8 = vld [vmem:[%s619_s1 + $0x1e0] sm:$0xff]  ;;  %v340_v10 = vpack.c.bf16 %v29_v2, %v28_v1  ;;  %v342_v14 = vpack.c.bf16 %v47_v7, %v46_v6 }
  0x12   :  { %335 = vmatprep.subr.bf16.mxu0 %v334_v52  ;;  %v79_v9 = vld [vmem:[%s619_s1 + $0x1e8] sm:$0xff]  ;;  %v30_v11 = vld [vmem:[%s619_s1 + $0x60] sm:$0xff]  ;;  %v372_v13 = vpack.c.bf16 %v61_v5, %v60_v3  ;;  %v48_v19 = vld [vmem:[%s619_s1 + $0xf0] sm:$0xff] }
  0x13   :  { %365 = vmatpush3.bf16.msra.mxu1 %v364_v51  ;;  %v31_v12 = vld [vmem:[%s619_s1 + $0x68] sm:$0xff]  ;;  %v62_v15 = vld [vmem:[%s619_s1 + $0x160] sm:$0xff]  ;;  %v374_v18 = vpack.c.bf16 %v79_v9, %v78_v8  ;;  %v49_v20 = vld [vmem:[%s619_s1 + $0xf8] sm:$0xff] }
  0x14   :  { %367 = vmatprep.subr.bf16.mxu1 %v366_v56  ;;  %v63_v16 = vld [vmem:[%s619_s1 + $0x168] sm:$0xff]  ;;  %v17_v21 = vld [vmem:[%s620_s0 + $0x18] sm:$0xff]  ;;  %v80_v22 = vld [vmem:[%s619_s1 + $0x1f0] sm:$0xff]  ;;  %v344_v24 = vpack.c.bf16 %v31_v12, %v30_v11  ;;  %v346_v26 = vpack.c.bf16 %v49_v20, %v48_v19 }
  0x15   :  { %337 = vmatpush3.bf16.msra.mxu0 %v336_v62  ;;  %v15_v17 = vld [vmem:[%s620_s0 + $0x8] sm:$0xff]  ;;  %v81_v23 = vld [vmem:[%s619_s1 + $0x1f8] sm:$0xff]  ;;  %223 = vmatprep.mubr.f32.mxu1 %v17_v21  ;;  %v376_v25 = vpack.c.bf16 %v63_v16, %v62_v15  ;;  %v32_v27 = vld [vmem:[%s619_s1 + $0x70] sm:$0xff] }
  0x16   :  { %339 = vmatprep.subr.bf16.mxu0 %v338_v0  ;;  %153 = vmatprep.mubr.f32.mxu0 %v15_v17  ;;  %v33_v28 = vld [vmem:[%s619_s1 + $0x78] sm:$0xff]  ;;  %v378_v29 = vpack.c.bf16 %v81_v23, %v80_v22  ;;  %v64_v30 = vld [vmem:[%s619_s1 + $0x170] sm:$0xff]  ;;  %v14_v34 = vld [vmem:[%s620_s0] sm:$0xff] }
  0x17   :  { %369 = vmatpush3.bf16.msra.mxu1 %v368_v63  ;;  %v65_v31 = vld [vmem:[%s619_s1 + $0x178] sm:$0xff]  ;;  %v348_v32 = vpack.c.bf16 %v33_v28, %v32_v27  ;;  %v16_v35 = vld [vmem:[%s620_s0 + $0x10] sm:$0xff]  ;;  %v247_v37 = vld [vmem:[%s621_s2] ss:$0 sm:$0xff] }
  0x18   :  { %371 = vmatprep.subr.bf16.mxu1 %v370_v4  ;;  %v380_v33 = vpack.c.bf16 %v65_v31, %v64_v30 }
  0x19   :  { %341 = vmatpush3.bf16.msra.mxu0 %v340_v10 }
  0x1a   :  { %343 = vmatprep.subr.bf16.mxu0 %v342_v14 }
  0x1b   :  { %373 = vmatpush3.bf16.msra.mxu1 %v372_v13 }
  0x1c   :  { %375 = vmatprep.subr.bf16.mxu1 %v374_v18 }
  0x1d   :  { %345 = vmatpush3.bf16.msra.mxu0 %v344_v24 }
  0x1e   :  { %347 = vmatprep.subr.bf16.mxu0 %v346_v26 }
  0x1f   :  { %377 = vmatpush3.bf16.msra.mxu1 %v376_v25 }
  0x20   :  { %379 = vmatprep.subr.bf16.mxu1 %v378_v29 }
  0x21   :  { %349 = vmatpush3.bf16.msra.mxu0 %v348_v32 }
  0x23   :  { %381 = vmatpush3.bf16.msra.mxu1 %v380_v33 }
  0x24   :  { %154 = vmatmul.mubr.f32.vlgmr.msra.gmra.mrb[0].mxu0 %v14_v34 }
  0x26   :  { %224 = vmatmul.mubr.f32.vlgmr.msra.gmra.mrb[0].mxu1 %v16_v35 }
  0xf7   :  { %v280_v36 = vpop.f32.mrb[0].mxu0 }
  0xf8   :  { %v281_v38 = vpop.f32.mrb[1].mxu0 }
  0xf9   :  { %v315_v39 = vpop.f32.mrb[0].mxu1  ;;  %v282_v40 = vadd.f32 %v281_v38, %v280_v36 }
  0xfa   :  { %v316_v41 = vpop.f32.mrb[1].mxu1 }
  0xfb   :  { %v317_v42 = vadd.f32 %v316_v41, %v315_v39  ;;  %v156_v43 = vadd.f32 %v282_v40, %v247_v37 }
  0xfd   :  { %v226_v44 = vadd.f32 %v317_v42, %v156_v43 }
  0xff   :  { %v230_v45 = vsel %vm229_vm0, %v226_v44, -inf }
 0x100   :  { %231 = vmax.xlane.f32.xlu0 %v230_v45 }
 0x18d   :  { %v232_v46 = vpop.xlane.xlu0 %231 }
 0x18e   :  { %v233_v47 = vsub.f32 %v226_v44, %v232_v46 }
 0x190   :  { %v234_v48 = vmul.f32 1.442695, %v233_v47 }
 0x192   :  { %382 = vpow2.f32 %v234_v48 }
 0x19c   :  { %v383_v49 = vpop.eup %382 }
 0x19d   :  { %v236_v50 = vsel %vm229_vm0, %v383_v49, 0.0 }
 0x19e   :  { %237 = vadd.xlane.f32.xlu0 %v236_v50 }
 0x22b   :  { %v238_v51 = vpop.xlane.xlu0 %237 }
 0x22c   :  { %384 = vlog2.f32 %v238_v51 }
 0x236   :  { %v385_v52 = vpop.eup %384 }
 0x237   :  { %v240_v53 = vmul.f32 0.6931472, %v385_v52 }
 0x239   :  { %v241_v54 = vsub.f32 %v233_v47, %v240_v53 }
 0x23b   :  { %242 = vst.msk [vmem:[%s622_s3] sm:$0xff] %vm229_vm0, %v241_v54 }

</bundles_post_ra>
